<compile_context>
chip_gen: v7x
topology: tpu7x:2x2x1
jax: 0.10.0
libtpu: 0.0.40
codegen_flags: <defaults>
</compile_context>

<pallas_src>
import functools

import jax
import jax.numpy as jnp
from jax.experimental import pallas as pl
from jax.experimental.pallas import tpu as pltpu


def _softplus(v):
    # numerically-stable softplus, all VPU/EUP ops, kept in f32
    return jnp.maximum(v, 0.0) + jnp.log1p(jnp.exp(-jnp.abs(v)))


def _round_up(x, m):
    return -(-x // m) * m


def ib_estimator_kernel(x1_ref, x1r_ref, x2_ref,
                        w1a_ref, w1b_ref, b1_ref,
                        w2_ref, b2_ref, w3_ref, b3_ref,
                        out_ref, *, batch, tile_b, compute_dtype):
    # x1_ref / x1r_ref : [TB, S1]   (x1 and x1 rolled by 1 along batch)
    # x2_ref           : [TB, S2]
    # w1a_ref          : [S1, Hp],  w1b_ref: [S2, Hp],  b1_ref: [1, Hp]
    # w2_ref           : [Hp, Hp],  b2_ref : [1, Hp]
    # w3_ref           : [1, Hp],   b3_ref : [1, 1]
    # out_ref          : [1, 1, 128] per-tile partial sum (broadcast on lanes)
    i = pl.program_id(0)
    cd = compute_dtype

    # ---- layer 1: shared x2 contribution, computed once -------------------
    x2 = x2_ref[...].astype(cd)
    w1b = w1b_ref[...].astype(cd)
    h_shared = jnp.dot(x2, w1b, preferred_element_type=jnp.float32) + b1_ref[...]

    # ---- layer 1: stacked pos/neg -> single MXU pass through w1a ----------
    x1_both = jnp.concatenate([x1_ref[...], x1r_ref[...]], axis=0).astype(cd)
    w1a = w1a_ref[...].astype(cd)
    h1 = jnp.dot(x1_both, w1a, preferred_element_type=jnp.float32)
    h1 = h1 + jnp.tile(h_shared, (2, 1))
    h1 = jnp.maximum(h1, 0.0)                                   # f32 [2TB, Hp]

    # ---- layer 2: single stacked MXU pass ----------------------------------
    w2 = w2_ref[...].astype(cd)
    h2 = jnp.dot(h1.astype(cd), w2, preferred_element_type=jnp.float32)
    h2 = jnp.maximum(h2 + b2_ref[...], 0.0)                     # f32 [2TB, Hp]

    # ---- layer 3: Linear(H, 1) as broadcast-mul + lane reduction -----------
    logits = jnp.sum(h2 * w3_ref[...], axis=-1, keepdims=True) + b3_ref[...]

    pos = logits[:tile_b]                                       # [TB, 1]
    neg = logits[tile_b:]                                       # [TB, 1]

    # mask rows that are batch padding
    row = i * tile_b + jax.lax.broadcasted_iota(jnp.int32, (tile_b, 1), 0)
    valid = (row < batch).astype(jnp.float32)

    partial = jnp.sum((_softplus(-pos) + _softplus(neg)) * valid)
    out_ref[...] = jnp.full((1, 1, 128), partial, dtype=jnp.float32)


def ib_estimator_forward(x1, x2, params, *, block_batch=128,
                         use_bf16_matmul=False):
    """JAX wrapper reproducing IBEstimator.forward(x1, x2)."""
    w1, b1, w2, b2, w3, b3 = params          # w1: [S1+S2, H] (pre-transposed)
    B, S1 = x1.shape
    S2 = x2.shape[1]
    H = w1.shape[1]

    # ---- pad hidden dim to a lane-dense multiple of 128 --------------------
    # Zero padding is semantically inert: padded hidden units compute
    # relu(0) = 0 and carry zero weight in w2 / w3.
    Hp = _round_up(max(H, 128), 128)

    def pad_cols(a, n):
        return jnp.pad(a, ((0, 0), (0, n - a.shape[1])))

    w1p = pad_cols(w1, Hp)
    b1p = pad_cols(b1, Hp)
    w2p = jnp.pad(w2, ((0, Hp - H), (0, Hp - H)))
    b2p = pad_cols(b2, Hp)
    w3p = pad_cols(w3, Hp)

    w1a = w1p[:S1]                           # [S1, Hp]  (x1 half of layer 1)
    w1b = w1p[S1:]                           # [S2, Hp]  (x2 half of layer 1)

    # Roll x1 by one along batch.  Only a [B, S1] copy (the full [B, D]
    # concats are gone).  A +1-row shift crosses tile boundaries, so it
    # cannot be folded into the batch-tile index_map.
    x1r = jnp.roll(x1, 1, axis=0)

    # ---- batch tiling -------------------------------------------------------
    TB = _round_up(min(block_batch, B), 8)   # sublane-aligned batch tile
    Bp = _round_up(B, TB)
    num_tiles = Bp // TB

    def pad_rows(a):
        return jnp.pad(a, ((0, Bp - B), (0, 0)))

    x1p, x1rp, x2p = pad_rows(x1), pad_rows(x1r), pad_rows(x2)

    compute_dtype = jnp.bfloat16 if use_bf16_matmul else jnp.float32

    kernel = functools.partial(
        ib_estimator_kernel,
        batch=B, tile_b=TB, compute_dtype=compute_dtype)

    x_spec = lambda f: pl.BlockSpec((TB, f), lambda i: (i, 0))
    w_spec = lambda shape: pl.BlockSpec(shape, lambda i: (0, 0))

    partials = pl.pallas_call(
        kernel,
        out_shape=jax.ShapeDtypeStruct((num_tiles, 1, 128), jnp.float32),
        grid=(num_tiles,),
        in_specs=[
            x_spec(S1),                 # x1
            x_spec(S1),                 # x1 rolled
            x_spec(S2),                 # x2
            w_spec((S1, Hp)),           # w1a
            w_spec((S2, Hp)),           # w1b
            w_spec((1, Hp)),            # b1
            w_spec((Hp, Hp)),           # w2
            w_spec((1, Hp)),            # b2
            w_spec((1, Hp)),            # w3 (Linear(H,1) weight row)
            w_spec((1, 1)),             # b3
        ],
        out_specs=pl.BlockSpec((1, 1, 128), lambda i: (i, 0, 0)),
        compiler_params=pltpu.CompilerParams(
            dimension_semantics=("parallel",)),
    )(x1p, x1rp, x2p, w1a, w1b, b1p, w2p, b2p, w3p, b3)

    # tiny final reduction in JAX:
    #   -mean(softplus(-pos)) - mean(softplus(neg)) = -(sum_pos + sum_neg)/B
    total = jnp.sum(partials[:, 0, 0])
    return -total / B


def init_params(key, size1, size2, hidden_dim):
    """Deterministic synthetic init matching nn.Linear shapes.

    Weights stored pre-transposed: [in_features, out_features].
    """
    d_in = size1 + size2
    k1, k2, k3, k4, k5, k6 = jax.random.split(key, 6)

    def uniform(k, shape, fan_in):
        bound = 1.0 / jnp.sqrt(float(fan_in))
        return jax.random.uniform(k, shape, jnp.float32, -bound, bound)

    w1 = uniform(k1, (d_in, hidden_dim), d_in)
    b1 = uniform(k2, (1, hidden_dim), d_in)
    w2 = uniform(k3, (hidden_dim, hidden_dim), hidden_dim)
    b2 = uniform(k4, (1, hidden_dim), hidden_dim)
    w3 = uniform(k5, (1, hidden_dim), hidden_dim)   # Linear(H, 1) weight row
    b3 = uniform(k6, (1, 1), hidden_dim)
    return (w1, b1, w2, b2, w3, b3)


def reference_forward(x1, x2, params):
    """Pure-JAX reference (mirrors the PyTorch forward)."""
    w1, b1, w2, b2, w3, b3 = params

    def net(x):
        h1 = jnp.maximum(x @ w1 + b1, 0.0)
        h2 = jnp.maximum(h1 @ w2 + b2, 0.0)
        return jnp.sum(h2 * w3, axis=-1, keepdims=True) + b3

    pos = net(jnp.concatenate([x1, x2], 1))
    neg = net(jnp.concatenate([jnp.roll(x1, 1, 0), x2], 1))
    return -jnp.mean(jax.nn.softplus(-pos)) - jnp.mean(jax.nn.softplus(neg))


if __name__ == "__main__":
    B, SIZE1, SIZE2, HIDDEN = 8, 16, 16, 32

    key = jax.random.PRNGKey(0)
    kx1, kx2, kp = jax.random.split(key, 3)
    x1 = jax.random.normal(kx1, (B, SIZE1), jnp.float32)
    x2 = jax.random.normal(kx2, (B, SIZE2), jnp.float32)
    params = init_params(kp, SIZE1, SIZE2, HIDDEN)

    ref = jax.block_until_ready(reference_forward(x1, x2, params))

    # f32 path (matches the reference to fp tolerance)
    out = jax.block_until_ready(ib_estimator_forward(x1, x2, params))
    assert jnp.allclose(out, ref, atol=1e-5, rtol=1e-5), (out, ref)

    # bf16-MXU-operand path (v6e / v7x fast path); elementwise stays f32,
    # so only matmul rounding differs -> loose tolerance.
    out_bf16 = jax.block_until_ready(
        ib_estimator_forward(x1, x2, params, use_bf16_matmul=True))
    assert jnp.allclose(out_bf16, ref, atol=5e-2, rtol=5e-2), (out_bf16, ref)

    # off-multiple batch -> exercises batch padding + mask + multi-tile grid
    B2 = 10
    kx3, kx4 = jax.random.split(jax.random.PRNGKey(1), 2)
    y1 = jax.random.normal(kx3, (B2, SIZE1), jnp.float32)
    y2 = jax.random.normal(kx4, (B2, SIZE2), jnp.float32)
    ref2 = jax.block_until_ready(reference_forward(y1, y2, params))
    out2 = jax.block_until_ready(
        ib_estimator_forward(y1, y2, params, block_batch=8))
    assert jnp.allclose(out2, ref2, atol=1e-5, rtol=1e-5), (out2, ref2)

    print("KERNEL_OK")
</pallas_src>

<mosaic_0001>
module attributes {stable_mosaic.version = 11 : i64} {
  func.func @ib_estimator_kernel(%arg0: i32, %arg1: memref<8x16xf32, #tpu.memory_space<vmem>>, %arg2: memref<8x16xf32, #tpu.memory_space<vmem>>, %arg3: memref<8x16xf32, #tpu.memory_space<vmem>>, %arg4: memref<16x128xf32, #tpu.memory_space<vmem>>, %arg5: memref<16x128xf32, #tpu.memory_space<vmem>>, %arg6: memref<1x128xf32, #tpu.memory_space<vmem>>, %arg7: memref<128x128xf32, #tpu.memory_space<vmem>>, %arg8: memref<1x128xf32, #tpu.memory_space<vmem>>, %arg9: memref<1x128xf32, #tpu.memory_space<vmem>>, %arg10: memref<1x1xf32, #tpu.memory_space<vmem>>, %arg11: memref<1x1x128xf32, #tpu.memory_space<vmem>>) attributes {dimension_semantics = [#tpu.dimension_semantics<parallel>], iteration_bounds = array<i64: 1>, scalar_prefetch = 0 : i64, scratch_operands = 0 : i64, tpu.core_type = #tpu.core_type<tc>, window_params = [{transform_indices = @transform_0, window_bounds = array<i64: 8, 16>}, {transform_indices = @transform_1, window_bounds = array<i64: 8, 16>}, {transform_indices = @transform_2, window_bounds = array<i64: 8, 16>}, {pipeline_mode = #tpu.pipeline_mode<synchronous>, transform_indices = @transform_3, window_bounds = array<i64: 16, 128>}, {pipeline_mode = #tpu.pipeline_mode<synchronous>, transform_indices = @transform_4, window_bounds = array<i64: 16, 128>}, {pipeline_mode = #tpu.pipeline_mode<synchronous>, transform_indices = @transform_5, window_bounds = array<i64: 1, 128>}, {pipeline_mode = #tpu.pipeline_mode<synchronous>, transform_indices = @transform_6, window_bounds = array<i64: 128, 128>}, {pipeline_mode = #tpu.pipeline_mode<synchronous>, transform_indices = @transform_7, window_bounds = array<i64: 1, 128>}, {pipeline_mode = #tpu.pipeline_mode<synchronous>, transform_indices = @transform_8, window_bounds = array<i64: 1, 128>}, {pipeline_mode = #tpu.pipeline_mode<synchronous>, transform_indices = @transform_9, window_bounds = array<i64: 1, 1>}, {transform_indices = @transform_10, window_bounds = array<i64: 1, 1, 128>}]} {
    %c0 = arith.constant 0 : index
    %c0_0 = arith.constant 0 : index
    %0 = vector.load %arg3[%c0, %c0_0] : memref<8x16xf32, #tpu.memory_space<vmem>>, vector<8x16xf32>
    %c0_1 = arith.constant 0 : index
    %c0_2 = arith.constant 0 : index
    %1 = vector.load %arg5[%c0_1, %c0_2] : memref<16x128xf32, #tpu.memory_space<vmem>>, vector<16x128xf32>
    %cst = arith.constant dense<0.000000e+00> : vector<8x128xf32>
    %2 = tpu.matmul %0, %1, %cst {dimension_numbers = #tpu.dot_dimension_numbers<[1], [0], [0], [1], [0, 0, 1, 1], [], []>} : vector<8x16xf32>, vector<16x128xf32>, vector<8x128xf32> -> vector<8x128xf32>
    %c0_3 = arith.constant 0 : index
    %c0_4 = arith.constant 0 : index
    %3 = vector.load %arg6[%c0_3, %c0_4] : memref<1x128xf32, #tpu.memory_space<vmem>>, vector<1x128xf32>
    %4 = vector.broadcast %3 : vector<1x128xf32> to vector<8x128xf32>
    %5 = arith.addf %2, %4 : vector<8x128xf32>
    %c0_5 = arith.constant 0 : index
    %c0_6 = arith.constant 0 : index
    %6 = vector.load %arg1[%c0_5, %c0_6] : memref<8x16xf32, #tpu.memory_space<vmem>>, vector<8x16xf32>
    %c0_7 = arith.constant 0 : index
    %c0_8 = arith.constant 0 : index
    %7 = vector.load %arg2[%c0_7, %c0_8] : memref<8x16xf32, #tpu.memory_space<vmem>>, vector<8x16xf32>
    %8 = tpu.concatenate %6, %7 in 0 : vector<8x16xf32>, vector<8x16xf32> -> vector<16x16xf32>
    %c0_9 = arith.constant 0 : index
    %c0_10 = arith.constant 0 : index
    %9 = vector.load %arg4[%c0_9, %c0_10] : memref<16x128xf32, #tpu.memory_space<vmem>>, vector<16x128xf32>
    %cst_11 = arith.constant dense<0.000000e+00> : vector<16x128xf32>
    %10 = tpu.matmul %8, %9, %cst_11 {dimension_numbers = #tpu.dot_dimension_numbers<[1], [0], [0], [1], [0, 0, 1, 1], [], []>} : vector<16x16xf32>, vector<16x128xf32>, vector<16x128xf32> -> vector<16x128xf32>
    %11 = tpu.concatenate %5, %5 in 0 : vector<8x128xf32>, vector<8x128xf32> -> vector<16x128xf32>
    %12 = arith.addf %10, %11 : vector<16x128xf32>
    %cst_12 = arith.constant 0.000000e+00 : f32
    %13 = vector.broadcast %cst_12 : f32 to vector<16x128xf32>
    %14 = arith.maximumf %12, %13 : vector<16x128xf32>
    %c0_13 = arith.constant 0 : index
    %c0_14 = arith.constant 0 : index
    %15 = vector.load %arg7[%c0_13, %c0_14] : memref<128x128xf32, #tpu.memory_space<vmem>>, vector<128x128xf32>
    %cst_15 = arith.constant dense<0.000000e+00> : vector<16x128xf32>
    %16 = tpu.matmul %14, %15, %cst_15 {dimension_numbers = #tpu.dot_dimension_numbers<[1], [0], [0], [1], [0, 0, 1, 1], [], []>} : vector<16x128xf32>, vector<128x128xf32>, vector<16x128xf32> -> vector<16x128xf32>
    %c0_16 = arith.constant 0 : index
    %c0_17 = arith.constant 0 : index
    %17 = vector.load %arg8[%c0_16, %c0_17] : memref<1x128xf32, #tpu.memory_space<vmem>>, vector<1x128xf32>
    %18 = vector.broadcast %17 : vector<1x128xf32> to vector<16x128xf32>
    %19 = arith.addf %16, %18 : vector<16x128xf32>
    %cst_18 = arith.constant 0.000000e+00 : f32
    %20 = vector.broadcast %cst_18 : f32 to vector<16x128xf32>
    %21 = arith.maximumf %19, %20 : vector<16x128xf32>
    %c0_19 = arith.constant 0 : index
    %c0_20 = arith.constant 0 : index
    %22 = vector.load %arg9[%c0_19, %c0_20] : memref<1x128xf32, #tpu.memory_space<vmem>>, vector<1x128xf32>
    %23 = vector.broadcast %22 : vector<1x128xf32> to vector<16x128xf32>
    %24 = arith.mulf %21, %23 : vector<16x128xf32>
    %cst_21 = arith.constant dense<0.000000e+00> : vector<16xf32>
    %25 = vector.multi_reduction <add>, %24, %cst_21 [1] : vector<16x128xf32> to vector<16xf32>
    %26 = vector.shape_cast %25 : vector<16xf32> to vector<16x1xf32>
    %c0_22 = arith.constant 0 : index
    %c0_23 = arith.constant 0 : index
    %27 = vector.load %arg10[%c0_22, %c0_23] : memref<1x1xf32, #tpu.memory_space<vmem>>, vector<1x1xf32>
    %28 = vector.broadcast %27 : vector<1x1xf32> to vector<16x1xf32>
    %29 = arith.addf %26, %28 : vector<16x1xf32>
    %30 = vector.extract_strided_slice %29 {offsets = [0, 0], sizes = [8, 1], strides = [1, 1]} : vector<16x1xf32> to vector<8x1xf32>
    %31 = vector.extract_strided_slice %29 {offsets = [8, 0], sizes = [8, 1], strides = [1, 1]} : vector<16x1xf32> to vector<8x1xf32>
    %c8_i32 = arith.constant 8 : i32
    %32 = arith.muli %arg0, %c8_i32 : i32
    %33 = tpu.iota {dimensions = array<i32: 0>} : vector<8x1xi32>
    %34 = vector.broadcast %32 : i32 to vector<8x1xi32>
    %35 = arith.addi %34, %33 : vector<8x1xi32>
    %c8_i32_24 = arith.constant 8 : i32
    %36 = vector.broadcast %c8_i32_24 : i32 to vector<8x1xi32>
    %37 = arith.cmpi slt, %35, %36 : vector<8x1xi32>
    %38 = arith.extui %37 : vector<8x1xi1> to vector<8x1xi32>
    %39 = arith.sitofp %38 : vector<8x1xi32> to vector<8x1xf32>
    %cst_25 = arith.constant 0.000000e+00 : f32
    %40 = vector.broadcast %cst_25 : f32 to vector<8x1xf32>
    %41 = arith.subf %40, %30 : vector<8x1xf32>
    %cst_26 = arith.constant 0.000000e+00 : f32
    %42 = vector.broadcast %cst_26 : f32 to vector<8x1xf32>
    %43 = arith.maximumf %41, %42 : vector<8x1xf32>
    %44 = math.absf %41 : vector<8x1xf32>
    %cst_27 = arith.constant 0.000000e+00 : f32
    %45 = vector.broadcast %cst_27 : f32 to vector<8x1xf32>
    %46 = arith.subf %45, %44 : vector<8x1xf32>
    %47 = math.exp %46 : vector<8x1xf32>
    %48 = math.log1p %47 : vector<8x1xf32>
    %49 = arith.addf %43, %48 : vector<8x1xf32>
    %cst_28 = arith.constant 0.000000e+00 : f32
    %50 = vector.broadcast %cst_28 : f32 to vector<8x1xf32>
    %51 = arith.maximumf %31, %50 : vector<8x1xf32>
    %52 = math.absf %31 : vector<8x1xf32>
    %cst_29 = arith.constant 0.000000e+00 : f32
    %53 = vector.broadcast %cst_29 : f32 to vector<8x1xf32>
    %54 = arith.subf %53, %52 : vector<8x1xf32>
    %55 = math.exp %54 : vector<8x1xf32>
    %56 = math.log1p %55 : vector<8x1xf32>
    %57 = arith.addf %51, %56 : vector<8x1xf32>
    %58 = arith.addf %49, %57 : vector<8x1xf32>
    %59 = arith.mulf %58, %39 : vector<8x1xf32>
    %60 = vector.shape_cast %59 : vector<8x1xf32> to vector<1x8x1xf32>
    %cst_30 = arith.constant dense<0.000000e+00> : vector<1xf32>
    %61 = vector.multi_reduction <add>, %60, %cst_30 [1, 2] : vector<1x8x1xf32> to vector<1xf32>
    %62 = vector.shape_cast %61 : vector<1xf32> to vector<1x1x1xf32>
    %63 = vector.extract %62[0, 0, 0] : f32 from vector<1x1x1xf32>
    %64 = vector.broadcast %63 : f32 to vector<1x1x128xf32>
    %c0_31 = arith.constant 0 : index
    %c0_32 = arith.constant 0 : index
    %c0_33 = arith.constant 0 : index
    %65 = vector.load %arg11[%c0_31, %c0_32, %c0_33] : memref<1x1x128xf32, #tpu.memory_space<vmem>>, vector<1x1x128xf32>
    tpu.vector_store %arg11[%c0_31, %c0_32, %c0_33], %64 {strides = array<i32>} : memref<1x1x128xf32, #tpu.memory_space<vmem>>, vector<1x1x128xf32>,
    return
  }
  func.func @transform_0(%arg0: i32) -> (i32, i32) {
    %c0_i32 = arith.constant 0 : i32
    %c0_i32_0 = arith.constant 0 : i32
    return %arg0, %c0_i32 : i32, i32
  }
  func.func @transform_1(%arg0: i32) -> (i32, i32) {
    %c0_i32 = arith.constant 0 : i32
    %c0_i32_0 = arith.constant 0 : i32
    return %arg0, %c0_i32 : i32, i32
  }
  func.func @transform_2(%arg0: i32) -> (i32, i32) {
    %c0_i32 = arith.constant 0 : i32
    %c0_i32_0 = arith.constant 0 : i32
    return %arg0, %c0_i32 : i32, i32
  }
  func.func @transform_3(%arg0: i32) -> (i32, i32) {
    %c0_i32 = arith.constant 0 : i32
    %c0_i32_0 = arith.constant 0 : i32
    %c0_i32_1 = arith.constant 0 : i32
    return %c0_i32, %c0_i32_0 : i32, i32
  }
  func.func @transform_4(%arg0: i32) -> (i32, i32) {
    %c0_i32 = arith.constant 0 : i32
    %c0_i32_0 = arith.constant 0 : i32
    %c0_i32_1 = arith.constant 0 : i32
    return %c0_i32, %c0_i32_0 : i32, i32
  }
  func.func @transform_5(%arg0: i32) -> (i32, i32) {
    %c0_i32 = arith.constant 0 : i32
    %c0_i32_0 = arith.constant 0 : i32
    %c0_i32_1 = arith.constant 0 : i32
    return %c0_i32, %c0_i32_0 : i32, i32
  }
  func.func @transform_6(%arg0: i32) -> (i32, i32) {
    %c0_i32 = arith.constant 0 : i32
    %c0_i32_0 = arith.constant 0 : i32
    %c0_i32_1 = arith.constant 0 : i32
    return %c0_i32, %c0_i32_0 : i32, i32
  }
  func.func @transform_7(%arg0: i32) -> (i32, i32) {
    %c0_i32 = arith.constant 0 : i32
    %c0_i32_0 = arith.constant 0 : i32
    %c0_i32_1 = arith.constant 0 : i32
    return %c0_i32, %c0_i32_0 : i32, i32
  }
  func.func @transform_8(%arg0: i32) -> (i32, i32) {
    %c0_i32 = arith.constant 0 : i32
    %c0_i32_0 = arith.constant 0 : i32
    %c0_i32_1 = arith.constant 0 : i32
    return %c0_i32, %c0_i32_0 : i32, i32
  }
  func.func @transform_9(%arg0: i32) -> (i32, i32) {
    %c0_i32 = arith.constant 0 : i32
    %c0_i32_0 = arith.constant 0 : i32
    %c0_i32_1 = arith.constant 0 : i32
    return %c0_i32, %c0_i32_0 : i32, i32
  }
  func.func @transform_10(%arg0: i32) -> (i32, i32, i32) {
    %c0_i32 = arith.constant 0 : i32
    %c0_i32_0 = arith.constant 0 : i32
    %c0_i32_1 = arith.constant 0 : i32
    return %arg0, %c0_i32, %c0_i32_0 : i32, i32, i32
  }
}

</mosaic_0001>

<bundles_post_ra>
// kernel: tpu_custom_call.1
= control target key start
LH: loop header
LB: loop body
LE: loop exit
PB: predicated region body
PF: predicated region fallthrough
CT: control target
= control target key end

     0   :  { %s917_s0 = inlined_call_operand.hbm [shape: f32[8,16], index: 0, kind: input, shape index: {}]   ;;  %s918_s1 = inlined_call_operand.hbm [shape: f32[8,16], index: 1, kind: input, shape index: {}]   ;;  %s919_s2 = inlined_call_operand.hbm [shape: f32[8,16], index: 2, kind: input, shape index: {}]   ;;  %s920_s3 = inlined_call_operand.hbm [shape: f32[16,128], index: 3, kind: input, shape index: {}]   ;;  %s921_s4 = inlined_call_operand.vmem [shape: f32[16,128], index: 4, kind: input, shape index: {}]   ;;  %s922_s5 = inlined_call_operand.vmem [shape: f32[1,128], index: 5, kind: input, shape index: {}]   ;;  %s923_s6 = inlined_call_operand.hbm [shape: f32[128,128], index: 6, kind: input, shape index: {}]   ;;  %s924_s7 = inlined_call_operand.vmem [shape: f32[1,128], index: 7, kind: input, shape index: {}]   ;;  %s925_s8 = inlined_call_operand.vmem [shape: f32[1,128], index: 8, kind: input, shape index: {}]   ;;  %s926_s9 = inlined_call_operand.<no memory space> [shape: f32[1,1], index: 9, kind: input, shape index: {}]   ;;  %s927_s10 = inlined_call_operand.hbm [shape: f32[1,1,128], index: 10, kind: output, shape index: {}]  }
   0x1   :  { %v15_v0 = vstv %s926_s9 }
   0x2   :  { %16 = vst [vmem:[#allocation2] sm:$0x1] %v15_v0 }
   0x3   :  { %17 = vsyncpa [#allocation4], 0 }
   0x4   :  { %18 = vsyncpa [#allocation7], 0 }
   0x5   :  { %19 = vsyncpa [#allocation10], 0 }
   0x6   :  { %20 = vsyncpa [#allocation5], 0  ;;  %s745_s15 = smov [#allocation6]   ;;  %s746_s17 = smov [#allocation9]  }
   0x7   :  { %s37_s16 = sshll.u32 %s745_s15, 4  ;;  %s56_s18 = sshll.u32 %s746_s17, 4  ;;  %s38_s16 = int_to_ptr.vmem [resolvable:$true] %s37_s16  ;;  %s814_s18 = int_to_ptr.vmem [resolvable:$true] %s56_s18 }
   0x8   :  { %s605_s21 = scalar_lea.hbm %s918_s1, 128 }
   0x9   :  { %p606_p0 = scmp.ne.s32.totalorder %s918_s1, %s605_s21  ;;  %p609_p1 = scmp.lt.u32.totalorder %s605_s21, %s918_s1 }
   0xb   :  { %p611_p2 = pnand %p609_p1, %p606_p0 }
   0xd   :  { %614 = shalt.err (!%p611_p2)
}
   0xe   :  { %s615_s25 = scalar_lea.vmem %s38_s16, 128  ;;  %p620_p4 = scmp.lt.s32.totalorder %s38_s16, %s38_s16 }
   0xf   :  { %p616_p3 = scmp.ne.s32.totalorder %s38_s16, %s615_s25  ;;  %p621_p5 = scmp.lt.s32.totalorder %s615_s25, %s615_s25 }
  0x11   :  { %p622_p6 = por %p621_p5, %p620_p4 }
  0x13   :  { %p623_p7 = pnand %p622_p6, %p616_p3 }
  0x15   :  { %626 = shalt.err (!%p623_p7)
}
  0x16   :  { %40 = dma.hbm_to_vmem [thread:$0]  %s918_s1, 128, %s38_s16, [#allocation7]  }
  0x17   :  { %s627_s30 = scalar_lea.hbm %s920_s3, 256 }
  0x18   :  { %p628_p8 = scmp.ne.s32.totalorder %s920_s3, %s627_s30  ;;  %p631_p9 = scmp.lt.u32.totalorder %s627_s30, %s920_s3 }
  0x1a   :  { %p633_p10 = pnand %p631_p9, %p628_p8 }
  0x1c   :  { %636 = shalt.err (!%p633_p10)
}
  0x1d   :  { %s637_s15 = scalar_lea.vmem %s814_s18, 256  ;;  %p642_p12 = scmp.lt.s32.totalorder %s814_s18, %s814_s18 }
  0x1e   :  { %p638_p11 = scmp.ne.s32.totalorder %s814_s18, %s637_s15  ;;  %p643_p13 = scmp.lt.s32.totalorder %s637_s15, %s637_s15 }
  0x20   :  { %p644_p0 = por %p643_p13, %p642_p12 }
  0x22   :  { %p645_p1 = pnand %p644_p0, %p638_p11 }
  0x24   :  { %648 = shalt.err (!%p645_p1)
}
  0x25   :  { %s747_s1 = smov 128   ;;  %s748_s16 = smov 8  }
  0x26   :  { %62 = dma.hbm_to_vmem [thread:$0]  %s920_s3, 256, %s814_s18, [#allocation10], %s747_s1, %s747_s1, %s748_s16  }
  0x27   :  { %s749_s20 = smov [#allocation3]   ;;  %s750_s22 = smov [#allocation8]  }
  0x28   :  { %s27_s21 = sshll.u32 %s749_s20, 4  ;;  %s47_s23 = sshll.u32 %s750_s22, 4  ;;  %s28_s21 = int_to_ptr.vmem [resolvable:$true] %s27_s21  ;;  %s48_s23 = int_to_ptr.vmem [resolvable:$true] %s47_s23 }
  0x29   :  { %s649_s25 = scalar_lea.hbm %s917_s0, 128 }
  0x2a   :  { %p650_p2 = scmp.ne.s32.totalorder %s917_s0, %s649_s25  ;;  %p653_p3 = scmp.lt.u32.totalorder %s649_s25, %s917_s0 }
  0x2c   :  { %p655_p4 = pnand %p653_p3, %p650_p2 }
  0x2e   :  { %658 = shalt.err (!%p655_p4)
}
  0x2f   :  { %s659_s3 = scalar_lea.vmem %s28_s21, 128  ;;  %p664_p6 = scmp.lt.s32.totalorder %s28_s21, %s28_s21 }
  0x30   :  { %p660_p5 = scmp.ne.s32.totalorder %s28_s21, %s659_s3  ;;  %p665_p7 = scmp.lt.s32.totalorder %s659_s3, %s659_s3 }
  0x32   :  { %p666_p8 = por %p665_p7, %p664_p6 }
  0x34   :  { %p667_p9 = pnand %p666_p8, %p660_p5 }
  0x36   :  { %670 = shalt.err (!%p667_p9)
}
  0x37   :  { %30 = dma.hbm_to_vmem [thread:$0]  %s917_s0, 128, %s28_s21, [#allocation4]  }
  0x38   :  { %s671_s13 = scalar_lea.hbm %s919_s2, 128 }
  0x39   :  { %p672_p10 = scmp.ne.s32.totalorder %s919_s2, %s671_s13  ;;  %p675_p11 = scmp.lt.u32.totalorder %s671_s13, %s919_s2 }
  0x3b   :  { %p677_p12 = pnand %p675_p11, %p672_p10 }
  0x3d   :  { %680 = shalt.err (!%p677_p12)
}
  0x3e   :  { %s681_s20 = scalar_lea.vmem %s48_s23, 128  ;;  %p686_p0 = scmp.lt.s32.totalorder %s48_s23, %s48_s23 }
  0x3f   :  { %p682_p13 = scmp.ne.s32.totalorder %s48_s23, %s681_s20  ;;  %p687_p1 = scmp.lt.s32.totalorder %s681_s20, %s681_s20 }
  0x41   :  { %p688_p2 = por %p687_p1, %p686_p0 }
  0x43   :  { %p689_p3 = pnand %p688_p2, %p682_p13 }
  0x45   :  { %692 = shalt.err (!%p689_p3)
}
  0x46   :  { %50 = dma.hbm_to_vmem [thread:$0]  %s919_s2, 128, %s48_s23, [#allocation7]  }
  0x47   :  { %s751_s22 = smov [#allocation11]   ;;  %s693_s26 = scalar_lea.hbm %s923_s6, 2048 }
  0x48   :  { %s72_s9 = sshll.u32 %s751_s22, 4  ;;  %p694_p4 = scmp.ne.s32.totalorder %s923_s6, %s693_s26  ;;  %s73_s9 = int_to_ptr.vmem [resolvable:$true] %s72_s9 }
  0x49   :  { %p697_p5 = scmp.lt.u32.totalorder %s693_s26, %s923_s6 }
  0x4b   :  { %p699_p6 = pnand %p697_p5, %p694_p4 }
  0x4d   :  { %702 = shalt.err (!%p699_p6)
}
  0x4e   :  { %s703_s18 = scalar_lea.vmem %s73_s9, 2048  ;;  %p708_p8 = scmp.lt.s32.totalorder %s73_s9, %s73_s9 }
  0x4f   :  { %p704_p7 = scmp.ne.s32.totalorder %s73_s9, %s703_s18  ;;  %p709_p9 = scmp.lt.s32.totalorder %s703_s18, %s703_s18 }
  0x51   :  { %p710_p10 = por %p709_p9, %p708_p8 }
  0x53   :  { %p711_p11 = pnand %p710_p10, %p704_p7 }
  0x55   :  { %714 = shalt.err (!%p711_p11)
}
  0x56   :  { %78 = dma.hbm_to_vmem [thread:$0]  %s923_s6, 2048, %s73_s9, [#allocation10], %s747_s1, %s747_s1, %s748_s16  }
  0x57   :  { %737 = dma.done.wait [#allocation4], 128  }
  0x58   :  { %738 = vsyncadd [#allocation4], 4294967168 }
  0x59   :  { %739 = dma.done.wait [#allocation7], 256  }
  0x5a   :  { %740 = vsyncadd [#allocation7], 4294967040 }
  0x5b   :  { %741 = dma.done.wait [#allocation10], 2304  }
  0x5c   :  { %742 = vsyncadd [#allocation10], 4294964992  ;;  %v752_v1 = vmov 0.0|0.0   ;;  %vm753_vm0 = vmmov 0   ;;  %v754_v2 = vmov 0.0   ;;  %v101_v3 = vld [vmem:[%s921_s4] sm:$0xff] }
  0x5d   :  { %545 = vmatprep.subr.bf16.mxu1 %v752_v1  ;;  %500 = vmatprep.mubr.msk.f32.mxu1 %vm753_vm0, %v754_v2  ;;  %v102_v4 = vld [vmem:[%s921_s4 + $0x8] sm:$0xff]  ;;  %v186_v6 = vld [vmem:[#allocation9] sm:$0xff]  ;;  %v272_v10 = vld [vmem:[#allocation11 + $0x8] sm:$0xff]  ;;  %vm110_vm1 = vcmask 130048   ;;  %vm434_vm4 = vcmask 7168  }
  0x5e   :  { %v546_v5 = vpack.c.bf16 %v102_v4, %v101_v3  ;;  %v187_v7 = vld [vmem:[#allocation9 + $0x8] sm:$0xff]  ;;  %v271_v9 = vld [vmem:[#allocation11] sm:$0xff]  ;;  %v100_v11 = vld [vmem:[#allocation8] sm:$0xff] }
  0x5f   :  { %v548_v8 = vpack.c.bf16 %v187_v7, %v186_v6  ;;  %v552_v12 = vpack.c.bf16 %v272_v10, %v271_v9  ;;  %v273_v13 = vld [vmem:[#allocation11 + $0x10] sm:$0xff]  ;;  %v274_v14 = vld [vmem:[#allocation11 + $0x18] sm:$0xff]  ;;  %v275_v17 = vld [vmem:[#allocation11 + $0x20] sm:$0xff] }
  0x60   :  { %547 = vmatpush3.bf16.msra.mxu1 %v546_v5  ;;  %v184_v15 = vld [vmem:[#allocation3] sm:$0xff]  ;;  %v556_v16 = vpack.c.bf16 %v274_v14, %v273_v13  ;;  %v276_v18 = vld [vmem:[#allocation11 + $0x28] sm:$0xff]  ;;  %v185_v19 = vld [vmem:[#allocation6] sm:$0xff] }
  0x61   :  { %549 = vmatprep.subr.bf16.mxu1 %v548_v8  ;;  %553 = vmatprep.subr.bf16.mxu0 %v552_v12  ;;  %v560_v20 = vpack.c.bf16 %v276_v18, %v275_v17  ;;  %v277_v21 = vld [vmem:[#allocation11 + $0x30] sm:$0xff]  ;;  %v278_v22 = vld [vmem:[#allocation11 + $0x38] sm:$0xff]  ;;  %v279_v24 = vld [vmem:[#allocation11 + $0x40] sm:$0xff] }
  0x62   :  { %555 = vmatpush3.bf16.msra.mxu0 %v552_v12  ;;  %v564_v23 = vpack.c.bf16 %v278_v22, %v277_v21  ;;  %v280_v25 = vld [vmem:[#allocation11 + $0x48] sm:$0xff]  ;;  %v281_v27 = vld [vmem:[#allocation11 + $0x50] sm:$0xff]  ;;  %v282_v28 = vld [vmem:[#allocation11 + $0x58] sm:$0xff] }
  0x63   :  { %501 = vmatmul.mubr.msk.f32.vlgmr.msra.gmra.mrb[0].mxu1 %vm110_vm1, %v100_v11  ;;  %557 = vmatprep.subr.bf16.mxu0 %v556_v16  ;;  %v568_v26 = vpack.c.bf16 %v280_v25, %v279_v24  ;;  %v572_v29 = vpack.c.bf16 %v282_v28, %v281_v27  ;;  %v283_v30 = vld [vmem:[#allocation11 + $0x60] sm:$0xff]  ;;  %v284_v31 = vld [vmem:[#allocation11 + $0x68] sm:$0xff]  ;;  %v285_v33 = vld [vmem:[#allocation11 + $0x70] sm:$0xff] }
  0x64   :  { %551 = vmatpush3.bf16.msra.mxu1 %v548_v8  ;;  %507 = vmatprep.mubr.msk.f32.mxu1 %vm110_vm1, %v184_v15  ;;  %v576_v32 = vpack.c.bf16 %v284_v31, %v283_v30  ;;  %v286_v34 = vld [vmem:[#allocation11 + $0x78] sm:$0xff]  ;;  %v464_v36 = vld [vmem:[%s922_s5] ss:$0 sm:$0xff] }
  0x65   :  { %v580_v35 = vpack.c.bf16 %v286_v34, %v285_v33  ;;  %v468_v46 = vld [vmem:[%s924_s7] ss:$0 sm:$0xff]  ;;  %s755_s7 = smov [#allocation12]  }
  0x66   :  { %559 = vmatpush3.bf16.msra.mxu0 %v556_v16  ;;  %v469_v51 = vld [vmem:[%s925_s8] ss:$0 sm:$0xff]  ;;  %s453_s8 = sshll.u32 %s755_s7, 4  ;;  %s454_s8 = int_to_ptr.vmem [resolvable:$true] %s453_s8 }
  0x67   :  { %508 = vmatmul.mubr.msk.f32.vlgmr.msra.gmra.mrb[2].mxu1 %vm110_vm1, %v185_v19  ;;  %561 = vmatprep.subr.bf16.mxu0 %v560_v20  ;;  %v470_v56 = vld [vmem:[#allocation2] ss:$0 sm:$0xff]  ;;  %s715_s17 = scalar_lea.vmem %s454_s8, 16  ;;  %s719_s19 = scalar_lea.vmem %s454_s8, 32 }
  0x68   :  { %p716_p12 = scmp.ne.s32.totalorder %s454_s8, %s715_s17  ;;  %p720_p13 = scmp.lt.s32.totalorder %s454_s8, %s454_s8 }
  0x69   :  { %p721_p0 = scmp.lt.s32.totalorder %s719_s19, %s715_s17 }
  0x6a   :  { %563 = vmatpush3.bf16.msra.mxu0 %v560_v20 }
  0x6b   :  { %565 = vmatprep.subr.bf16.mxu0 %v564_v23  ;;  %p722_p1 = por %p721_p0, %p720_p13 }
  0x6d   :  { %p723_p2 = pnand %p722_p1, %p716_p12 }
  0x6e   :  { %567 = vmatpush3.bf16.msra.mxu0 %v564_v23 }
  0x6f   :  { %569 = vmatprep.subr.bf16.mxu0 %v568_v26 }
  0x72   :  { %571 = vmatpush3.bf16.msra.mxu0 %v568_v26 }
  0x73   :  { %573 = vmatprep.subr.bf16.mxu0 %v572_v29 }
  0x76   :  { %575 = vmatpush3.bf16.msra.mxu0 %v572_v29 }
  0x77   :  { %577 = vmatprep.subr.bf16.mxu0 %v576_v32 }
  0x7a   :  { %579 = vmatpush3.bf16.msra.mxu0 %v576_v32 }
  0x7b   :  { %581 = vmatprep.subr.bf16.mxu0 %v580_v35 }
  0x7e   :  { %583 = vmatpush3.bf16.msra.mxu0 %v580_v35 }
 0x136   :  { %v180_v37 = vpop.f32.mrb[0].mxu1 }
 0x137   :  { %v502_v38 = vpop.f32.mrb[1].mxu1  ;;  %v181_v39 = vadd.f32 %v464_v36, %v180_v37 }
 0x13a   :  { %v509_v40 = vpop.f32.mrb[2].mxu1 }
 0x13b   :  { %v266_v41 = vadd.f32 %v509_v40, %v181_v39  ;;  %v260_v42 = vpop.f32.mrb[3].mxu1 }
 0x13c   :  { %v261_v43 = vadd.f32 %v260_v42, %v181_v39 }
 0x13d   :  { %v270_v45 = vmax.f32 %v266_v41, 0.0 }
 0x13e   :  { %v269_v44 = vmax.f32 %v261_v43, 0.0 }
 0x140   :  { %542 = vmatprep.mubr.f32.mxu0 %v269_v44 }
 0x141   :  { %543 = vmatmul.mubr.f32.vlgmr.msra.gmra.mrb[0].mxu0 %v270_v45 }
 0x214   :  { %v544_v47 = vpop.f32.mrb[0].mxu0 }
 0x215   :  { %v360_v48 = vpop.f32.mrb[1].mxu0  ;;  %v366_v49 = vadd.f32 %v544_v47, %v468_v46 }
 0x216   :  { %v361_v50 = vadd.f32 %v468_v46, %v360_v48 }
 0x217   :  { %v370_v53 = vmax.f32 %v366_v49, 0.0 }
 0x218   :  { %v369_v52 = vmax.f32 %v361_v50, 0.0 }
 0x219   :  { %v379_v55 = vmul.f32 %v469_v51, %v370_v53 }
 0x21a   :  { %v378_v54 = vmul.f32 %v469_v51, %v369_v52 }
 0x21c   :  { %380 = vadd.xlane.f32.xlu0 %v378_v54 }
 0x220   :  { %382 = vadd.xlane.f32.xlu0 %v379_v55 }
 0x2a9   :  { %v381_v57 = vpop.xlane.xlu0 %380 }
 0x2aa   :  { %v391_v58 = vadd.f32 %v470_v56, %v381_v57 }
 0x2ac   :  { %v401_v59 = vsub.f32 0.0, %v391_v58 }
 0x2ad   :  { %v383_v60 = vpop.xlane.xlu0 %382 }
 0x2ae   :  { %v403_v61 = vand.u32 2147483647, %v401_v59  ;;  %v392_v62 = vadd.f32 %v470_v56, %v383_v60  ;;  %v402_v21 = vmax.f32 %v401_v59, 0.0 }
 0x2b0   :  { %v404_v63 = vsub.f32 0.0, %v403_v61  ;;  %v418_v0 = vand.u32 2147483647, %v392_v62  ;;  %v417_v22 = vmax.f32 %v392_v62, 0.0 }
 0x2b2   :  { %v405_v1 = vmul.f32 1.442695, %v404_v63  ;;  %v419_v2 = vsub.f32 0.0, %v418_v0 }
 0x2b4   :  { %597 = vpow2.f32 %v405_v1  ;;  %v420_v3 = vmul.f32 1.442695, %v419_v2 }
 0x2b6   :  { %599 = vpow2.f32 %v420_v3 }
 0x2be   :  { %v598_v4 = vpop.eup %597 }
 0x2bf   :  { %v407_v5 = vadd.f32 1.0, %v598_v4  ;;  %v410_v8 = vmul.f32 -0.5, %v598_v4  ;;  %v413_v11 = vand.u32 2147483647, %v598_v4 }
 0x2c0   :  { %v600_v6 = vpop.eup %599 }
 0x2c1   :  { %601 = vlog2.f32 %v407_v5  ;;  %v422_v7 = vadd.f32 1.0, %v600_v6  ;;  %v425_v9 = vmul.f32 -0.5, %v600_v6  ;;  %v411_v10 = vadd.f32 1.0, %v410_v8 }
 0x2c2   :  { %v428_v14 = vand.u32 2147483647, %v600_v6  ;;  %vm414_vm2 = vcmp.lt.f32.partialorder %v413_v11, 0.0004427343 }
 0x2c3   :  { %603 = vlog2.f32 %v422_v7  ;;  %v426_v12 = vadd.f32 1.0, %v425_v9  ;;  %v412_v16 = vmul.f32 %v598_v4, %v411_v10 }
 0x2c4   :  { %vm429_vm3 = vcmp.lt.f32.partialorder %v428_v14, 0.0004427343 }
 0x2c5   :  { %v427_v20 = vmul.f32 %v600_v6, %v426_v12 }
 0x2cb   :  { %v602_v13 = vpop.eup %601 }
 0x2cc   :  { %v409_v15 = vmul.f32 0.6931472, %v602_v13 }
 0x2cd   :  { %v604_v17 = vpop.eup %603 }
 0x2ce   :  { %v415_v18 = vsel %vm414_vm2, %v412_v16, %v409_v15  ;;  %v424_v19 = vmul.f32 0.6931472, %v604_v17 }
 0x2cf   :  { %v416_v24 = vadd.f32 %v415_v18, %v402_v21 }
 0x2d0   :  { %v430_v23 = vsel %vm429_vm3, %v427_v20, %v424_v19 }
 0x2d1   :  { %v431_v25 = vadd.f32 %v430_v23, %v417_v22 }
 0x2d3   :  { %v432_v26 = vadd.f32 %v431_v25, %v416_v24 }
 0x2d5   :  { %v435_v27 = vsel %vm434_vm4, %v432_v26, 0.0 }
 0x2d6   :  { %436 = vadd.xlane.f32.xlu1 %v435_v27 }
 0x363   :  { %v437_v28 = vpop.xlane.xlu1 %436 }
 0x364   :  { %v438_v29 = vrot.slane %v437_v28, 4 }
 0x366   :  { %v439_v30 = vadd.f32 %v438_v29, %v437_v28 }
 0x368   :  { %v440_v31 = vrot.slane %v439_v30, 2 }
 0x36a   :  { %v441_v32 = vadd.f32 %v440_v31, %v439_v30 }
 0x36c   :  { %v442_v33 = vrot.slane %v441_v32, 1 }
 0x36e   :  { %v443_v34 = vadd.f32 %v442_v33, %v441_v32 }
 0x370   :  { %584 = vpush %v443_v34 }
 0x3a1   :  { %s585_s15 = spop %584 }
 0x3a2   :  { %v445_v35 = vstv %s585_s15 }
 0x3a3   :  { %446 = vst [vmem:[#allocation12] sm:$0x1] %v445_v35 }
 0x3a4   :  { %726 = shalt.err (!%p723_p2)
}
 0x3a5   :  { %s727_s21 = scalar_lea.hbm %s927_s10, 16 }
 0x3a6   :  { %p728_p3 = scmp.ne.s32.totalorder %s927_s10, %s727_s21  ;;  %p731_p4 = scmp.lt.u32.totalorder %s727_s21, %s927_s10 }
 0x3a8   :  { %p733_p5 = pnand %p731_p4, %p728_p3 }
 0x3aa   :  { %736 = shalt.err (!%p733_p5)
}
 0x3ab   :  { %456 = dma.vmem_to_hbm [thread:$0]  %s454_s8, 16, %s927_s10, [#allocation5]  }
 0x3ac   :  { %743 = dma.done.wait [#allocation5], 16  }
 0x3ad   :  { %744 = vsyncadd [#allocation5], 4294967280 }
 0x3ae   :  { %460 = vsyncpa [#allocation4], 1 }
 0x3af   :  { %461 = vsyncpa [#allocation7], 1 }
 0x3b0   :  { %462 = vsyncpa [#allocation10], 1 }
 0x3b1   :  { %463 = vsyncpa [#allocation5], 1 }

</bundles_post_ra>
